<compile_context>
chip_gen: v5e
topology: v5e:2x2
jax: 0.10.0
libtpu: 0.0.40
codegen_flags: <defaults>
</compile_context>

<pallas_src>
import jax
import jax.numpy as jnp
from jax.experimental import pallas as pl
from jax.experimental.pallas import tpu as pltpu


def _se_kernel(x_ref, pw_ref, b1_ref, w2t_ref, b2_ref, s_ref, o_ref):
    xv = x_ref[...]                                              # (Bt, CHW) f32
    # fc1 with the global-average-pool folded into its weights, then ReLU.
    h = jnp.dot(xv, pw_ref[...], preferred_element_type=jnp.float32)
    h = jnp.maximum(h + b1_ref[...], 0.0)                        # (Bt, hidden)
    # fc2 + sigmoid -> per-H gate.
    g = jnp.dot(h, w2t_ref[...], preferred_element_type=jnp.float32)
    g = jax.nn.sigmoid(g + b2_ref[...])                          # (Bt, H)
    # Expand the gate back to the flat CHW layout with a constant 0/1 indicator.
    gate = jnp.dot(g, s_ref[...], preferred_element_type=jnp.float32)  # (Bt, CHW)
    o_ref[...] = (xv * gate).astype(o_ref.dtype)


def make_se_module(w1, b1, w2, b2, *, C, H, W, block_b=256):
    """Prepare SE constants once; returns a jitted apply(x) for x:(B, C, H, W)."""
    hidden, ch = w1.shape
    # permute-before-pool semantics => the gated axis is H and H == channels.
    assert H == ch, "SEModule semantics require H == channels"
    assert w2.shape == (ch, hidden) and b1.shape == (hidden,) and b2.shape == (ch,)
    assert block_b % 8 == 0, "block_b must be a multiple of 8 (sublane tiling)"

    chw = C * H * W
    # h-index of every flattened (c, h, w) position in row-major NCHW order.
    h_of_f = (jnp.arange(chw) % (H * W)) // W                           # (CHW,)
    onehot = (h_of_f[:, None] == jnp.arange(H)[None, :]).astype(jnp.float32)
    pool_w = (onehot / float(C * W)) @ w1.T.astype(jnp.float32)         # (CHW, hidden)
    scatter = onehot.T                                                  # (H, CHW)
    b1r = b1.reshape(1, hidden).astype(jnp.float32)
    w2t = w2.T.astype(jnp.float32)                                      # (hidden, H)
    b2r = b2.reshape(1, ch).astype(jnp.float32)

    @jax.jit
    def apply(x):
        B = x.shape[0]
        assert x.shape == (B, C, H, W)
        x_flat = x.reshape(B, chw)            # layout-preserving reshape (free)
        bt = min(block_b, B)                  # full-extent block if B is small
        # Partial last block (B % bt != 0) is safe: batch rows are independent,
        # so padded garbage rows compute garbage gates that are never stored.
        grid = (pl.cdiv(B, bt),)
        out_flat = pl.pallas_call(
            _se_kernel,
            out_shape=jax.ShapeDtypeStruct((B, chw), x.dtype),
            grid=grid,
            in_specs=[
                pl.BlockSpec((bt, chw), lambda i: (i, 0)),       # x (lane-dense)
                pl.BlockSpec((chw, hidden), lambda i: (0, 0)),   # pool_w (const)
                pl.BlockSpec((1, hidden), lambda i: (0, 0)),     # b1     (const)
                pl.BlockSpec((hidden, ch), lambda i: (0, 0)),    # w2^T   (const)
                pl.BlockSpec((1, ch), lambda i: (0, 0)),         # b2     (const)
                pl.BlockSpec((ch, chw), lambda i: (0, 0)),       # scatter(const)
            ],
            out_specs=pl.BlockSpec((bt, chw), lambda i: (i, 0)),
            compiler_params=pltpu.CompilerParams(
                dimension_semantics=("parallel",)),
        )(x_flat, pool_w, b1r, w2t, b2r, scatter)
        return out_flat.reshape(B, C, H, W)

    return apply


def se_module_ref(x, w1, b1, w2, b2):
    """Pure-JAX mirror of the PyTorch forward (for correctness check)."""
    xp = jnp.transpose(x, (0, 2, 3, 1))              # (B, H, W, C)
    s = jnp.mean(xp, axis=(2, 3))                    # (B, H)
    h = jnp.maximum(s @ w1.T + b1, 0.0)
    g = jax.nn.sigmoid(h @ w2.T + b2)                # (B, H)
    out = xp * g[:, :, None, None]
    return jnp.transpose(out, (0, 3, 1, 2))          # (B, C, H, W)


if __name__ == "__main__":
    channels, reduction = 22, 4            # module defaults
    hidden = channels // reduction         # 5
    B, C, H, W = 16, 4, channels, 16       # H must equal `channels`

    key = jax.random.PRNGKey(0)
    kx, k1, k2, k3, k4 = jax.random.split(key, 5)

    x = jax.random.normal(kx, (B, C, H, W), dtype=jnp.float32)

    # deterministic PyTorch-style Linear init: U(-1/sqrt(fan_in), 1/sqrt(fan_in))
    bnd1 = 1.0 / (channels ** 0.5)
    w1 = jax.random.uniform(k1, (hidden, channels), jnp.float32, -bnd1, bnd1)
    b1 = jax.random.uniform(k2, (hidden,), jnp.float32, -bnd1, bnd1)
    bnd2 = 1.0 / (hidden ** 0.5)
    w2 = jax.random.uniform(k3, (channels, hidden), jnp.float32, -bnd2, bnd2)
    b2 = jax.random.uniform(k4, (channels,), jnp.float32, -bnd2, bnd2)

    # Small block_b here only to exercise a multi-step pipelined grid at this
    # tiny test size; the default (256) targets the >=0.5 MiB-per-block regime.
    se_apply = make_se_module(w1, b1, w2, b2, C=C, H=H, W=W, block_b=8)

    y = jax.block_until_ready(se_apply(x))
    y_ref = jax.block_until_ready(se_module_ref(x, w1, b1, w2, b2))

    assert y.shape == (B, C, H, W)
    assert jnp.allclose(y, y_ref, atol=1e-4, rtol=1e-4), (
        float(jnp.max(jnp.abs(y - y_ref))))

    print("KERNEL_OK")
</pallas_src>

<mosaic_0001>
module attributes {stable_mosaic.version = 11 : i64} {
  func.func @_se_kernel(%arg0: i32, %arg1: memref<8x1408xf32, #tpu.memory_space<vmem>>, %arg2: memref<1408x5xf32, #tpu.memory_space<vmem>>, %arg3: memref<1x5xf32, #tpu.memory_space<vmem>>, %arg4: memref<5x22xf32, #tpu.memory_space<vmem>>, %arg5: memref<1x22xf32, #tpu.memory_space<vmem>>, %arg6: memref<22x1408xf32, #tpu.memory_space<vmem>>, %arg7: memref<8x1408xf32, #tpu.memory_space<vmem>>) attributes {dimension_semantics = [#tpu.dimension_semantics<parallel>], iteration_bounds = array<i64: 2>, scalar_prefetch = 0 : i64, scratch_operands = 0 : i64, tpu.core_type = #tpu.core_type<tc>, window_params = [{transform_indices = @transform_0, window_bounds = array<i64: 8, 1408>}, {pipeline_mode = #tpu.pipeline_mode<synchronous>, transform_indices = @transform_1, window_bounds = array<i64: 1408, 5>}, {pipeline_mode = #tpu.pipeline_mode<synchronous>, transform_indices = @transform_2, window_bounds = array<i64: 1, 5>}, {pipeline_mode = #tpu.pipeline_mode<synchronous>, transform_indices = @transform_3, window_bounds = array<i64: 5, 22>}, {pipeline_mode = #tpu.pipeline_mode<synchronous>, transform_indices = @transform_4, window_bounds = array<i64: 1, 22>}, {pipeline_mode = #tpu.pipeline_mode<synchronous>, transform_indices = @transform_5, window_bounds = array<i64: 22, 1408>}, {transform_indices = @transform_6, window_bounds = array<i64: 8, 1408>}]} {
    %c0 = arith.constant 0 : index
    %c0_0 = arith.constant 0 : index
    %0 = vector.load %arg1[%c0, %c0_0] : memref<8x1408xf32, #tpu.memory_space<vmem>>, vector<8x1408xf32>
    %c0_1 = arith.constant 0 : index
    %c0_2 = arith.constant 0 : index
    %1 = vector.load %arg2[%c0_1, %c0_2] : memref<1408x5xf32, #tpu.memory_space<vmem>>, vector<1408x5xf32>
    %cst = arith.constant dense<0.000000e+00> : vector<8x5xf32>
    %2 = tpu.matmul %0, %1, %cst {dimension_numbers = #tpu.dot_dimension_numbers<[1], [0], [0], [1], [0, 0, 1, 1], [], []>} : vector<8x1408xf32>, vector<1408x5xf32>, vector<8x5xf32> -> vector<8x5xf32>
    %c0_3 = arith.constant 0 : index
    %c0_4 = arith.constant 0 : index
    %3 = vector.load %arg3[%c0_3, %c0_4] : memref<1x5xf32, #tpu.memory_space<vmem>>, vector<1x5xf32>
    %4 = vector.broadcast %3 : vector<1x5xf32> to vector<8x5xf32>
    %5 = arith.addf %2, %4 : vector<8x5xf32>
    %cst_5 = arith.constant 0.000000e+00 : f32
    %6 = vector.broadcast %cst_5 : f32 to vector<8x5xf32>
    %7 = arith.maximumf %5, %6 : vector<8x5xf32>
    %c0_6 = arith.constant 0 : index
    %c0_7 = arith.constant 0 : index
    %8 = vector.load %arg4[%c0_6, %c0_7] : memref<5x22xf32, #tpu.memory_space<vmem>>, vector<5x22xf32>
    %cst_8 = arith.constant dense<0.000000e+00> : vector<8x22xf32>
    %9 = tpu.matmul %7, %8, %cst_8 {dimension_numbers = #tpu.dot_dimension_numbers<[1], [0], [0], [1], [0, 0, 1, 1], [], []>} : vector<8x5xf32>, vector<5x22xf32>, vector<8x22xf32> -> vector<8x22xf32>
    %c0_9 = arith.constant 0 : index
    %c0_10 = arith.constant 0 : index
    %10 = vector.load %arg5[%c0_9, %c0_10] : memref<1x22xf32, #tpu.memory_space<vmem>>, vector<1x22xf32>
    %11 = vector.broadcast %10 : vector<1x22xf32> to vector<8x22xf32>
    %12 = arith.addf %9, %11 : vector<8x22xf32>
    %13 = arith.negf %12 : vector<8x22xf32>
    %14 = math.exp %13 : vector<8x22xf32>
    %cst_11 = arith.constant 1.000000e+00 : f32
    %15 = vector.broadcast %cst_11 : f32 to vector<8x22xf32>
    %16 = arith.addf %15, %14 : vector<8x22xf32>
    %17 = arith.divf %15, %16 : vector<8x22xf32>
    %c0_12 = arith.constant 0 : index
    %c0_13 = arith.constant 0 : index
    %18 = vector.load %arg6[%c0_12, %c0_13] : memref<22x1408xf32, #tpu.memory_space<vmem>>, vector<22x1408xf32>
    %cst_14 = arith.constant dense<0.000000e+00> : vector<8x1408xf32>
    %19 = tpu.matmul %17, %18, %cst_14 {dimension_numbers = #tpu.dot_dimension_numbers<[1], [0], [0], [1], [0, 0, 1, 1], [], []>} : vector<8x22xf32>, vector<22x1408xf32>, vector<8x1408xf32> -> vector<8x1408xf32>
    %20 = arith.mulf %0, %19 : vector<8x1408xf32>
    %c0_15 = arith.constant 0 : index
    %c0_16 = arith.constant 0 : index
    %21 = vector.load %arg7[%c0_15, %c0_16] : memref<8x1408xf32, #tpu.memory_space<vmem>>, vector<8x1408xf32>
    tpu.vector_store %arg7[%c0_15, %c0_16], %20 {strides = array<i32>} : memref<8x1408xf32, #tpu.memory_space<vmem>>, vector<8x1408xf32>,
    return
  }
  func.func @transform_0(%arg0: i32) -> (i32, i32) {
    %c0_i32 = arith.constant 0 : i32
    %c0_i32_0 = arith.constant 0 : i32
    return %arg0, %c0_i32 : i32, i32
  }
  func.func @transform_1(%arg0: i32) -> (i32, i32) {
    %c0_i32 = arith.constant 0 : i32
    %c0_i32_0 = arith.constant 0 : i32
    %c0_i32_1 = arith.constant 0 : i32
    return %c0_i32, %c0_i32_0 : i32, i32
  }
  func.func @transform_2(%arg0: i32) -> (i32, i32) {
    %c0_i32 = arith.constant 0 : i32
    %c0_i32_0 = arith.constant 0 : i32
    %c0_i32_1 = arith.constant 0 : i32
    return %c0_i32, %c0_i32_0 : i32, i32
  }
  func.func @transform_3(%arg0: i32) -> (i32, i32) {
    %c0_i32 = arith.constant 0 : i32
    %c0_i32_0 = arith.constant 0 : i32
    %c0_i32_1 = arith.constant 0 : i32
    return %c0_i32, %c0_i32_0 : i32, i32
  }
  func.func @transform_4(%arg0: i32) -> (i32, i32) {
    %c0_i32 = arith.constant 0 : i32
    %c0_i32_0 = arith.constant 0 : i32
    %c0_i32_1 = arith.constant 0 : i32
    return %c0_i32, %c0_i32_0 : i32, i32
  }
  func.func @transform_5(%arg0: i32) -> (i32, i32) {
    %c0_i32 = arith.constant 0 : i32
    %c0_i32_0 = arith.constant 0 : i32
    %c0_i32_1 = arith.constant 0 : i32
    return %c0_i32, %c0_i32_0 : i32, i32
  }
  func.func @transform_6(%arg0: i32) -> (i32, i32) {
    %c0_i32 = arith.constant 0 : i32
    %c0_i32_0 = arith.constant 0 : i32
    return %arg0, %c0_i32 : i32, i32
  }
}

</mosaic_0001>

<bundles_post_ra>
// kernel: apply.1
= control target key start
LH: loop header
LB: loop body
LE: loop exit
PB: predicated region body
PF: predicated region fallthrough
CT: control target
= control target key end

     0   :  { %s1176_s21 = smov 0   ;;  %s1938_s0 = inlined_call_operand.vmem [shape: f32[16,1408], index: 0, kind: input, shape index: {}]   ;;  %s1939_s1 = inlined_call_operand.vmem [shape: f32[1408,5], index: 1, kind: input, shape index: {}]   ;;  %s1940_s2 = inlined_call_operand.vmem [shape: f32[1,5], index: 2, kind: input, shape index: {}]   ;;  %s1941_s3 = inlined_call_operand.vmem [shape: f32[5,22], index: 3, kind: input, shape index: {}]   ;;  %s1942_s4 = inlined_call_operand.vmem [shape: f32[1,22], index: 4, kind: input, shape index: {}]   ;;  %s1943_s5 = inlined_call_operand.vmem [shape: f32[22,1408], index: 5, kind: input, shape index: {}]   ;;  %s1944_s6 = inlined_call_operand.vmem [shape: f32[16,1408], index: 6, kind: output, shape index: {}]  }
   0x1 LB: > { %s1084_s22 = sadd.s32 4294967295, %s1139_s21   ;;  %p1088_p0 = scmp.ge.s32.totalorder %s1139_s21, 1  ;;  %s1139_s21 = sphi %s1176_s21, %s16_s21  }
   0x2   : > { %p212_p1 = scmp.lt.s32.totalorder %s1139_s21, 3 }
   0x4   : > { %p213_p2 = pnand %p1088_p0, %p212_p1 }
   0x5   : > { %p1456_p3 = scmp.lt.s32.totalorder (!%p213_p2), %s1084_s22, 1 }
   0x6   : > { %216 = sbr.rel (%p213_p2) target bundleno = 574 (0x23e), region = 44 }
   0xb   : > { %v278_v0 = vld [vmem:[%s1939_s1 + $0x78] sm:$0xff]  ;;  %v277_v2 = vld [vmem:[%s1939_s1 + $0x70] sm:$0xff]  ;;  %v276_v5 = vld [vmem:[%s1939_s1 + $0x68] sm:$0xff]  ;;  %s1947_s22 = smov (!%p1456_p3, %s1084_s22), 1  ;;  %vm673_vm0 = vcmask 1044480   ;;  %vm669_vm1 = vcmask 39936  }
   0xc   : > { %v310_v1 = vld [vmem:[%s1939_s1 + $0x178] sm:$0xff]  ;;  %443 = vmatpush.msra.mxu0 %v278_v0  ;;  %v309_v4 = vld [vmem:[%s1939_s1 + $0x170] sm:$0xff]  ;;  %v308_v7 = vld [vmem:[%s1939_s1 + $0x168] sm:$0xff]  ;;  %s1118_s14 = smul.u32 88, %s1947_s22  ;;  %vm753_vm2 = vcmask 1045504   ;;  %vm749_vm6 = vcmask 179200  }
   0xd   : > { %483 = vmatpush.msra.mxu2 %v310_v1  ;;  %v294_v3 = vld [vmem:[%s1939_s1 + $0xf8] sm:$0xff]  ;;  %v293_v6 = vld [vmem:[%s1939_s1 + $0xf0] sm:$0xff]  ;;  %v292_v8 = vld [vmem:[%s1939_s1 + $0xe8] sm:$0xff] }
   0xe   : > { %463 = vmatpush.msra.mxu1 %v294_v3  ;;  %444 = vmatpush.msra.mxu0 %v277_v2  ;;  %v275_v9 = vld [vmem:[%s1939_s1 + $0x60] sm:$0xff]  ;;  %v326_v12 = vld [vmem:[%s1939_s1 + $0x1f8] sm:$0xff]  ;;  %v325_v16 = vld [vmem:[%s1939_s1 + $0x1f0] sm:$0xff]  ;;  %s1544_s11 = scalar_lea.vmem %s1938_s0, %s1118_s14  ;;  %s1911_s27 = scalar_lea.vmem %s1944_s6, %s1118_s14 }
   0xf   : > { %484 = vmatpush.msra.mxu2 %v309_v4  ;;  %v307_v10 = vld [vmem:[%s1939_s1 + $0x160] sm:$0xff]  ;;  %v274_v13 = vld [vmem:[%s1939_s1 + $0x58] sm:$0xff]  ;;  %503 = vmatpush.msra.mxu3 %v326_v12  ;;  %v273_v17 = vld [vmem:[%s1939_s1 + $0x50] sm:$0xff] }
  0x10   : > { %464 = vmatpush.msra.mxu1 %v293_v6  ;;  %445 = vmatpush.msra.mxu0 %v276_v5  ;;  %v291_v11 = vld [vmem:[%s1939_s1 + $0xe0] sm:$0xff]  ;;  %v306_v14 = vld [vmem:[%s1939_s1 + $0x158] sm:$0xff]  ;;  %v305_v18 = vld [vmem:[%s1939_s1 + $0x150] sm:$0xff] }
  0x11   : > { %485 = vmatpush.msra.mxu2 %v308_v7  ;;  %v290_v15 = vld [vmem:[%s1939_s1 + $0xd8] sm:$0xff]  ;;  %504 = vmatpush.msra.mxu3 %v325_v16  ;;  %v324_v19 = vld [vmem:[%s1939_s1 + $0x1e8] sm:$0xff]  ;;  %v289_v20 = vld [vmem:[%s1939_s1 + $0xd0] sm:$0xff] }
  0x12   : > { %465 = vmatpush.msra.mxu1 %v292_v8  ;;  %446 = vmatpush.msra.mxu0 %v275_v9  ;;  %v323_v21 = vld [vmem:[%s1939_s1 + $0x1e0] sm:$0xff]  ;;  %v272_v22 = vld [vmem:[%s1939_s1 + $0x48] sm:$0xff]  ;;  %v322_v25 = vld [vmem:[%s1939_s1 + $0x1d8] sm:$0xff] }
  0x13   : > { %486 = vmatpush.msra.mxu2 %v307_v10  ;;  %v304_v23 = vld [vmem:[%s1939_s1 + $0x148] sm:$0xff]  ;;  %505 = vmatpush.msra.mxu3 %v324_v19  ;;  %v271_v26 = vld [vmem:[%s1939_s1 + $0x40] sm:$0xff]  ;;  %v321_v29 = vld [vmem:[%s1939_s1 + $0x1d0] sm:$0xff] }
  0x14   : > { %466 = vmatpush.msra.mxu1 %v291_v11  ;;  %447 = vmatpush.msra.mxu0 %v274_v13  ;;  %v288_v24 = vld [vmem:[%s1939_s1 + $0xc8] sm:$0xff]  ;;  %v303_v27 = vld [vmem:[%s1939_s1 + $0x140] sm:$0xff]  ;;  %v270_v30 = vld [vmem:[%s1939_s1 + $0x38] sm:$0xff] }
  0x15   : > { %487 = vmatpush.msra.mxu2 %v306_v14  ;;  %506 = vmatpush.msra.mxu3 %v323_v21  ;;  %v287_v28 = vld [vmem:[%s1939_s1 + $0xc0] sm:$0xff]  ;;  %v302_v31 = vld [vmem:[%s1939_s1 + $0x138] sm:$0xff]  ;;  %v320_v33 = vld [vmem:[%s1939_s1 + $0x1c8] sm:$0xff] }
  0x16   : > { %467 = vmatpush.msra.mxu1 %v290_v15  ;;  %448 = vmatpush.msra.mxu0 %v273_v17  ;;  %v286_v32 = vld [vmem:[%s1939_s1 + $0xb8] sm:$0xff]  ;;  %v269_v34 = vld [vmem:[%s1939_s1 + $0x30] sm:$0xff]  ;;  %v319_v37 = vld [vmem:[%s1939_s1 + $0x1c0] sm:$0xff] }
  0x17   : > { %488 = vmatpush.msra.mxu2 %v305_v18  ;;  %507 = vmatpush.msra.mxu3 %v322_v25  ;;  %v301_v35 = vld [vmem:[%s1939_s1 + $0x130] sm:$0xff]  ;;  %v268_v38 = vld [vmem:[%s1939_s1 + $0x28] sm:$0xff]  ;;  %v318_v41 = vld [vmem:[%s1939_s1 + $0x1b8] sm:$0xff] }
  0x18   : > { %468 = vmatpush.msra.mxu1 %v289_v20  ;;  %449 = vmatpush.msra.mxu0 %v272_v22  ;;  %v285_v36 = vld [vmem:[%s1939_s1 + $0xb0] sm:$0xff]  ;;  %v300_v39 = vld [vmem:[%s1939_s1 + $0x128] sm:$0xff]  ;;  %v267_v42 = vld [vmem:[%s1939_s1 + $0x20] sm:$0xff] }
  0x19   : > { %489 = vmatpush.msra.mxu2 %v304_v23  ;;  %508 = vmatpush.msra.mxu3 %v321_v29  ;;  %v284_v40 = vld [vmem:[%s1939_s1 + $0xa8] sm:$0xff]  ;;  %v299_v43 = vld [vmem:[%s1939_s1 + $0x120] sm:$0xff]  ;;  %v317_v45 = vld [vmem:[%s1939_s1 + $0x1b0] sm:$0xff] }
  0x1a   : > { %469 = vmatpush.msra.mxu1 %v288_v24  ;;  %450 = vmatpush.msra.mxu0 %v271_v26  ;;  %v283_v44 = vld [vmem:[%s1939_s1 + $0xa0] sm:$0xff]  ;;  %v266_v46 = vld [vmem:[%s1939_s1 + $0x18] sm:$0xff]  ;;  %v316_v49 = vld [vmem:[%s1939_s1 + $0x1a8] sm:$0xff] }
  0x1b   : > { %490 = vmatpush.msra.mxu2 %v303_v27  ;;  %509 = vmatpush.msra.mxu3 %v320_v33  ;;  %v298_v47 = vld [vmem:[%s1939_s1 + $0x118] sm:$0xff]  ;;  %v265_v50 = vld [vmem:[%s1939_s1 + $0x10] sm:$0xff]  ;;  %v315_v53 = vld [vmem:[%s1939_s1 + $0x1a0] sm:$0xff] }
  0x1c   : > { %470 = vmatpush.msra.mxu1 %v287_v28  ;;  %451 = vmatpush.msra.mxu0 %v270_v30  ;;  %v282_v48 = vld [vmem:[%s1939_s1 + $0x98] sm:$0xff]  ;;  %v297_v51 = vld [vmem:[%s1939_s1 + $0x110] sm:$0xff]  ;;  %v264_v54 = vld [vmem:[%s1939_s1 + $0x8] sm:$0xff] }
  0x1d   : > { %491 = vmatpush.msra.mxu2 %v302_v31  ;;  %510 = vmatpush.msra.mxu3 %v319_v37  ;;  %v281_v52 = vld [vmem:[%s1939_s1 + $0x90] sm:$0xff]  ;;  %v296_v55 = vld [vmem:[%s1939_s1 + $0x108] sm:$0xff]  ;;  %v314_v57 = vld [vmem:[%s1939_s1 + $0x198] sm:$0xff] }
  0x1e   : > { %471 = vmatpush.msra.mxu1 %v286_v32  ;;  %452 = vmatpush.msra.mxu0 %v269_v34  ;;  %v280_v56 = vld [vmem:[%s1939_s1 + $0x88] sm:$0xff]  ;;  %v263_v58 = vld [vmem:[%s1939_s1] sm:$0xff]  ;;  %v342_v60 = vld [vmem:[%s1939_s1 + $0x278] sm:$0xff] }
  0x1f   : > { %492 = vmatpush.msra.mxu2 %v301_v35  ;;  %511 = vmatpush.msra.mxu3 %v318_v41  ;;  %v295_v59 = vld [vmem:[%s1939_s1 + $0x100] sm:$0xff]  ;;  %v374_v61 = vld [vmem:[%s1939_s1 + $0x378] sm:$0xff]  ;;  %v313_v63 = vld [vmem:[%s1939_s1 + $0x190] sm:$0xff] }
  0x20   : > { %472 = vmatpush.msra.mxu1 %v285_v36  ;;  %453 = vmatpush.msra.mxu0 %v268_v38  ;;  %v279_v62 = vld [vmem:[%s1939_s1 + $0x80] sm:$0xff]  ;;  %v341_v0 = vld [vmem:[%s1939_s1 + $0x270] sm:$0xff]  ;;  %v358_v1 = vld [vmem:[%s1939_s1 + $0x2f8] sm:$0xff] }
  0x21   : > { %493 = vmatpush.msra.mxu2 %v300_v39  ;;  %512 = vmatpush.msra.mxu3 %v317_v45  ;;  %v373_v2 = vld [vmem:[%s1939_s1 + $0x370] sm:$0xff]  ;;  %v312_v3 = vld [vmem:[%s1939_s1 + $0x188] sm:$0xff]  ;;  %v311_v7 = vld [vmem:[%s1939_s1 + $0x180] sm:$0xff] }
  0x22   : > { %473 = vmatpush.msra.mxu1 %v284_v40  ;;  %454 = vmatpush.msra.mxu0 %v267_v42  ;;  %v340_v4 = vld [vmem:[%s1939_s1 + $0x268] sm:$0xff]  ;;  %v357_v5 = vld [vmem:[%s1939_s1 + $0x2f0] sm:$0xff]  ;;  %v339_v8 = vld [vmem:[%s1939_s1 + $0x260] sm:$0xff] }
  0x23   : > { %494 = vmatpush.msra.mxu2 %v299_v43  ;;  %513 = vmatpush.msra.mxu3 %v316_v49  ;;  %v372_v6 = vld [vmem:[%s1939_s1 + $0x368] sm:$0xff]  ;;  %v371_v10 = vld [vmem:[%s1939_s1 + $0x360] sm:$0xff]  ;;  %v390_v11 = vld [vmem:[%s1939_s1 + $0x3f8] sm:$0xff] }
  0x24   : > { %474 = vmatpush.msra.mxu1 %v283_v44  ;;  %455 = vmatpush.msra.mxu0 %v266_v46  ;;  %v356_v9 = vld [vmem:[%s1939_s1 + $0x2e8] sm:$0xff]  ;;  %v338_v12 = vld [vmem:[%s1939_s1 + $0x258] sm:$0xff]  ;;  %v355_v13 = vld [vmem:[%s1939_s1 + $0x2e0] sm:$0xff] }
  0x25   : > { %495 = vmatpush.msra.mxu2 %v298_v47  ;;  %514 = vmatpush.msra.mxu3 %v315_v53  ;;  %v370_v14 = vld [vmem:[%s1939_s1 + $0x358] sm:$0xff]  ;;  %v389_v15 = vld [vmem:[%s1939_s1 + $0x3f0] sm:$0xff]  ;;  %v388_v19 = vld [vmem:[%s1939_s1 + $0x3e8] sm:$0xff] }
  0x26   : > { %475 = vmatpush.msra.mxu1 %v282_v48  ;;  %456 = vmatpush.msra.mxu0 %v265_v50  ;;  %v337_v16 = vld [vmem:[%s1939_s1 + $0x250] sm:$0xff]  ;;  %v354_v17 = vld [vmem:[%s1939_s1 + $0x2d8] sm:$0xff]  ;;  %v336_v20 = vld [vmem:[%s1939_s1 + $0x248] sm:$0xff] }
  0x27   : > { %496 = vmatpush.msra.mxu2 %v297_v51  ;;  %515 = vmatpush.msra.mxu3 %v314_v57  ;;  %v369_v18 = vld [vmem:[%s1939_s1 + $0x350] sm:$0xff]  ;;  %v368_v22 = vld [vmem:[%s1939_s1 + $0x348] sm:$0xff]  ;;  %v387_v23 = vld [vmem:[%s1939_s1 + $0x3e0] sm:$0xff] }
  0x28   : > { %476 = vmatpush.msra.mxu1 %v281_v52  ;;  %457 = vmatpush.msra.mxu0 %v264_v54  ;;  %v353_v21 = vld [vmem:[%s1939_s1 + $0x2d0] sm:$0xff]  ;;  %v335_v24 = vld [vmem:[%s1939_s1 + $0x240] sm:$0xff]  ;;  %v352_v25 = vld [vmem:[%s1939_s1 + $0x2c8] sm:$0xff] }
  0x29   : > { %497 = vmatpush.msra.mxu2 %v296_v55  ;;  %516 = vmatpush.msra.mxu3 %v313_v63  ;;  %v367_v26 = vld [vmem:[%s1939_s1 + $0x340] sm:$0xff]  ;;  %v386_v27 = vld [vmem:[%s1939_s1 + $0x3d8] sm:$0xff]  ;;  %v385_v31 = vld [vmem:[%s1939_s1 + $0x3d0] sm:$0xff] }
  0x2a   : > { %477 = vmatpush.msra.mxu1 %v280_v56  ;;  %458 = vmatpush.msra.mxu0 %v263_v58  ;;  %v334_v28 = vld [vmem:[%s1939_s1 + $0x238] sm:$0xff]  ;;  %v351_v29 = vld [vmem:[%s1939_s1 + $0x2c0] sm:$0xff]  ;;  %v333_v32 = vld [vmem:[%s1939_s1 + $0x230] sm:$0xff] }
  0x2b   : > { %498 = vmatpush.msra.mxu2 %v295_v59  ;;  %517 = vmatpush.msra.mxu3 %v312_v3  ;;  %v366_v30 = vld [vmem:[%s1939_s1 + $0x338] sm:$0xff]  ;;  %v365_v34 = vld [vmem:[%s1939_s1 + $0x330] sm:$0xff]  ;;  %v384_v35 = vld [vmem:[%s1939_s1 + $0x3c8] sm:$0xff] }
  0x2c   : > { %523 = vmatpush.msrb.mxu0 %v342_v60  ;;  %478 = vmatpush.msra.mxu1 %v279_v62  ;;  %v350_v33 = vld [vmem:[%s1939_s1 + $0x2b8] sm:$0xff]  ;;  %v332_v36 = vld [vmem:[%s1939_s1 + $0x228] sm:$0xff]  ;;  %v349_v37 = vld [vmem:[%s1939_s1 + $0x2b0] sm:$0xff] }
  0x2d   : > { %563 = vmatpush.msrb.mxu2 %v374_v61  ;;  %518 = vmatpush.msra.mxu3 %v311_v7  ;;  %v364_v38 = vld [vmem:[%s1939_s1 + $0x328] sm:$0xff]  ;;  %v383_v39 = vld [vmem:[%s1939_s1 + $0x3c0] sm:$0xff]  ;;  %v382_v43 = vld [vmem:[%s1939_s1 + $0x3b8] sm:$0xff] }
  0x2e   : > { %524 = vmatpush.msrb.mxu0 %v341_v0  ;;  %543 = vmatpush.msrb.mxu1 %v358_v1  ;;  %v331_v40 = vld [vmem:[%s1939_s1 + $0x220] sm:$0xff]  ;;  %v348_v41 = vld [vmem:[%s1939_s1 + $0x2a8] sm:$0xff]  ;;  %v330_v44 = vld [vmem:[%s1939_s1 + $0x218] sm:$0xff] }
  0x2f   : > { %564 = vmatpush.msrb.mxu2 %v373_v2  ;;  %583 = vmatpush.msrb.mxu3 %v390_v11  ;;  %v363_v42 = vld [vmem:[%s1939_s1 + $0x320] sm:$0xff]  ;;  %v362_v46 = vld [vmem:[%s1939_s1 + $0x318] sm:$0xff]  ;;  %v381_v47 = vld [vmem:[%s1939_s1 + $0x3b0] sm:$0xff] }
  0x30   : > { %525 = vmatpush.msrb.mxu0 %v340_v4  ;;  %544 = vmatpush.msrb.mxu1 %v357_v5  ;;  %v347_v45 = vld [vmem:[%s1939_s1 + $0x2a0] sm:$0xff]  ;;  %v329_v48 = vld [vmem:[%s1939_s1 + $0x210] sm:$0xff]  ;;  %v346_v49 = vld [vmem:[%s1939_s1 + $0x298] sm:$0xff] }
  0x31   : > { %565 = vmatpush.msrb.mxu2 %v372_v6  ;;  %584 = vmatpush.msrb.mxu3 %v389_v15  ;;  %v361_v50 = vld [vmem:[%s1939_s1 + $0x310] sm:$0xff]  ;;  %v328_v51 = vld [vmem:[%s1939_s1 + $0x208] sm:$0xff]  ;;  %v1562_v55 = vld [vmem:[%s1544_s11] sm:$0xff] }
  0x32   : > { %526 = vmatpush.msrb.mxu0 %v339_v8  ;;  %545 = vmatpush.msrb.mxu1 %v356_v9  ;;  %v380_v52 = vld [vmem:[%s1939_s1 + $0x3a8] sm:$0xff]  ;;  %v345_v53 = vld [vmem:[%s1939_s1 + $0x290] sm:$0xff]  ;;  %v327_v56 = vld [vmem:[%s1939_s1 + $0x200] sm:$0xff] }
  0x33   : > { %566 = vmatpush.msrb.mxu2 %v371_v10  ;;  %585 = vmatpush.msrb.mxu3 %v388_v19  ;;  %v360_v54 = vld [vmem:[%s1939_s1 + $0x308] sm:$0xff]  ;;  %v359_v58 = vld [vmem:[%s1939_s1 + $0x300] sm:$0xff]  ;;  %v406_v59 = vld [vmem:[%s1939_s1 + $0x478] sm:$0xff] }
  0x34   : > { %527 = vmatpush.msrb.mxu0 %v338_v12  ;;  %546 = vmatpush.msrb.mxu1 %v355_v13  ;;  %v344_v57 = vld [vmem:[%s1939_s1 + $0x288] sm:$0xff]  ;;  %v1578_v60 = vld [vmem:[%s1544_s11 + $0x10] sm:$0xff]  ;;  %v343_v61 = vld [vmem:[%s1939_s1 + $0x280] sm:$0xff] }
  0x35   : > { %567 = vmatpush.msrb.mxu2 %v370_v14  ;;  %586 = vmatpush.msrb.mxu3 %v387_v23  ;;  %v438_v62 = vld [vmem:[%s1939_s1 + $0x578] sm:$0xff]  ;;  %v379_v63 = vld [vmem:[%s1939_s1 + $0x3a0] sm:$0xff]  ;;  %v1590_v0 = vld [vmem:[%s1544_s11 + $0x8] sm:$0xff] }
  0x36   : > { %528 = vmatpush.msrb.mxu0 %v337_v16  ;;  %547 = vmatpush.msrb.mxu1 %v354_v17  ;;  %v1593_v1 = vld [vmem:[%s1544_s11 + $0x18] sm:$0xff]  ;;  %v405_v2 = vld [vmem:[%s1939_s1 + $0x470] sm:$0xff]  ;;  %v404_v6 = vld [vmem:[%s1939_s1 + $0x468] sm:$0xff] }
  0x37   : > { %568 = vmatpush.msrb.mxu2 %v369_v18  ;;  %587 = vmatpush.msrb.mxu3 %v386_v27  ;;  %v422_v3 = vld [vmem:[%s1939_s1 + $0x4f8] sm:$0xff]  ;;  %v437_v4 = vld [vmem:[%s1939_s1 + $0x570] sm:$0xff]  ;;  %v436_v8 = vld [vmem:[%s1939_s1 + $0x568] sm:$0xff] }
  0x38   : > { %529 = vmatpush.msrb.mxu0 %v336_v20  ;;  %548 = vmatpush.msrb.mxu1 %v353_v21  ;;  %v378_v5 = vld [vmem:[%s1939_s1 + $0x398] sm:$0xff]  ;;  %v421_v7 = vld [vmem:[%s1939_s1 + $0x4f0] sm:$0xff]  ;;  %v403_v10 = vld [vmem:[%s1939_s1 + $0x460] sm:$0xff] }
  0x39   : > { %569 = vmatpush.msrb.mxu2 %v368_v22  ;;  %588 = vmatpush.msrb.mxu3 %v385_v31  ;;  %v377_v9 = vld [vmem:[%s1939_s1 + $0x390] sm:$0xff]  ;;  %v420_v11 = vld [vmem:[%s1939_s1 + $0x4e8] sm:$0xff]  ;;  %v435_v12 = vld [vmem:[%s1939_s1 + $0x560] sm:$0xff] }
  0x3a   : > { %530 = vmatpush.msrb.mxu0 %v335_v24  ;;  %549 = vmatpush.msrb.mxu1 %v352_v25  ;;  %v376_v13 = vld [vmem:[%s1939_s1 + $0x388] sm:$0xff]  ;;  %v1635_v14 = vld [vmem:[%s1544_s11 + $0x30] sm:$0xff]  ;;  %v402_v15 = vld [vmem:[%s1939_s1 + $0x458] sm:$0xff] }
  0x3b   : > { %570 = vmatpush.msrb.mxu2 %v367_v26  ;;  %589 = vmatpush.msrb.mxu3 %v384_v35  ;;  %v419_v16 = vld [vmem:[%s1939_s1 + $0x4e0] sm:$0xff]  ;;  %v434_v17 = vld [vmem:[%s1939_s1 + $0x558] sm:$0xff]  ;;  %v401_v21 = vld [vmem:[%s1939_s1 + $0x450] sm:$0xff] }
  0x3c   : > { %531 = vmatpush.msrb.mxu0 %v334_v28  ;;  %550 = vmatpush.msrb.mxu1 %v351_v29  ;;  %v375_v18 = vld [vmem:[%s1939_s1 + $0x380] sm:$0xff]  ;;  %v1654_v20 = vld [vmem:[%s1544_s11 + $0x38] sm:$0xff]  ;;  %v433_v23 = vld [vmem:[%s1939_s1 + $0x550] sm:$0xff] }
  0x3d   : > { %571 = vmatpush.msrb.mxu2 %v366_v30  ;;  %590 = vmatpush.msrb.mxu3 %v383_v39  ;;  %v1650_v19 = vld [vmem:[%s1544_s11 + $0x20] sm:$0xff]  ;;  %v418_v22 = vld [vmem:[%s1939_s1 + $0x4d8] sm:$0xff]  ;;  %v1667_v24 = vld [vmem:[%s1544_s11 + $0x28] sm:$0xff] }
  0x3e   : > { %532 = vmatpush.msrb.mxu0 %v333_v32  ;;  %551 = vmatpush.msrb.mxu1 %v350_v33  ;;  %v400_v25 = vld [vmem:[%s1939_s1 + $0x448] sm:$0xff]  ;;  %v417_v26 = vld [vmem:[%s1939_s1 + $0x4d0] sm:$0xff]  ;;  %v399_v28 = vld [vmem:[%s1939_s1 + $0x440] sm:$0xff] }
  0x3f   : > { %572 = vmatpush.msrb.mxu2 %v365_v34  ;;  %591 = vmatpush.msrb.mxu3 %v382_v43  ;;  %v432_v27 = vld [vmem:[%s1939_s1 + $0x548] sm:$0xff]  ;;  %v431_v30 = vld [vmem:[%s1939_s1 + $0x540] sm:$0xff]  ;;  %v398_v31 = vld [vmem:[%s1939_s1 + $0x438] sm:$0xff] }
  0x40   : > { %533 = vmatpush.msrb.mxu0 %v332_v36  ;;  %552 = vmatpush.msrb.mxu1 %v349_v37  ;;  %v416_v29 = vld [vmem:[%s1939_s1 + $0x4c8] sm:$0xff]  ;;  %v415_v32 = vld [vmem:[%s1939_s1 + $0x4c0] sm:$0xff]  ;;  %v430_v33 = vld [vmem:[%s1939_s1 + $0x538] sm:$0xff] }
  0x41   : > { %573 = vmatpush.msrb.mxu2 %v364_v38  ;;  %592 = vmatpush.msrb.mxu3 %v381_v47  ;;  %v397_v34 = vld [vmem:[%s1939_s1 + $0x430] sm:$0xff]  ;;  %v414_v35 = vld [vmem:[%s1939_s1 + $0x4b8] sm:$0xff]  ;;  %v396_v37 = vld [vmem:[%s1939_s1 + $0x428] sm:$0xff] }
  0x42   : > { %534 = vmatpush.msrb.mxu0 %v331_v40  ;;  %553 = vmatpush.msrb.mxu1 %v348_v41  ;;  %v429_v36 = vld [vmem:[%s1939_s1 + $0x530] sm:$0xff]  ;;  %v428_v39 = vld [vmem:[%s1939_s1 + $0x528] sm:$0xff]  ;;  %v395_v40 = vld [vmem:[%s1939_s1 + $0x420] sm:$0xff] }
  0x43   : > { %574 = vmatpush.msrb.mxu2 %v363_v42  ;;  %593 = vmatpush.msrb.mxu3 %v380_v52  ;;  %v413_v38 = vld [vmem:[%s1939_s1 + $0x4b0] sm:$0xff]  ;;  %v412_v41 = vld [vmem:[%s1939_s1 + $0x4a8] sm:$0xff]  ;;  %v427_v42 = vld [vmem:[%s1939_s1 + $0x520] sm:$0xff] }
  0x44   : > { %535 = vmatpush.msrb.mxu0 %v330_v44  ;;  %554 = vmatpush.msrb.mxu1 %v347_v45  ;;  %v394_v43 = vld [vmem:[%s1939_s1 + $0x418] sm:$0xff]  ;;  %v411_v44 = vld [vmem:[%s1939_s1 + $0x4a0] sm:$0xff] }
  0x45   : > { %575 = vmatpush.msrb.mxu2 %v362_v46  ;;  %459 = vmatmul.f32.vlgmr.msra.gmra.mxu0 %v1562_v55  ;;  %v426_v45 = vld [vmem:[%s1939_s1 + $0x518] sm:$0xff]  ;;  %v393_v46 = vld [vmem:[%s1939_s1 + $0x410] sm:$0xff]  ;;  %v391_v52 = vld [vmem:[%s1939_s1 + $0x400] sm:$0xff] }
  0x46   : > { %536 = vmatpush.msrb.mxu0 %v329_v48  ;;  %555 = vmatpush.msrb.mxu1 %v346_v49  ;;  %v410_v47 = vld [vmem:[%s1939_s1 + $0x498] sm:$0xff]  ;;  %v425_v48 = vld [vmem:[%s1939_s1 + $0x510] sm:$0xff]  ;;  %v392_v49 = vld [vmem:[%s1939_s1 + $0x408] sm:$0xff] }
  0x47   : > { %576 = vmatpush.msrb.mxu2 %v361_v50  ;;  %594 = vmatpush.msrb.mxu3 %v379_v63  ;;  %v409_v50 = vld [vmem:[%s1939_s1 + $0x490] sm:$0xff] }
  0x48   : > { %537 = vmatpush.msrb.mxu0 %v328_v51  ;;  %556 = vmatpush.msrb.mxu1 %v345_v53  ;;  %v424_v51 = vld [vmem:[%s1939_s1 + $0x508] sm:$0xff] }
  0x49   : > { %577 = vmatpush.msrb.mxu2 %v360_v54  ;;  %479 = vmatmul.f32.vlgmr.msra.gmra.mxu1 %v1590_v0  ;;  %v408_v53 = vld [vmem:[%s1939_s1 + $0x488] sm:$0xff]  ;;  %v423_v54 = vld [vmem:[%s1939_s1 + $0x500] sm:$0xff] }
  0x4a   : > { %538 = vmatpush.msrb.mxu0 %v327_v56  ;;  %557 = vmatpush.msrb.mxu1 %v344_v57  ;;  %v1762_v56 = vld [vmem:[%s1544_s11 + $0x40] sm:$0xff]  ;;  %v1765_v57 = vld [vmem:[%s1544_s11 + $0x50] sm:$0xff] }
  0x4b   : > { %578 = vmatpush.msrb.mxu2 %v359_v58  ;;  %519 = vmatmul.f32.vlgmr.msra.gmra.mxu3 %v1593_v1  ;;  %v407_v58 = vld [vmem:[%s1939_s1 + $0x480] sm:$0xff] }
  0x4c   : > { %603 = vmatpush.msra.mxu0 %v406_v59  ;;  %499 = vmatmul.f32.vlgmr.msra.gmra.mxu2 %v1578_v60  ;;  %v1771_v59 = vld [vmem:[%s1544_s11 + $0x48] sm:$0xff] }
  0x4d   : > { %558 = vmatpush.msrb.mxu1 %v343_v61  ;;  %643 = vmatpush.msra.mxu2 %v438_v62  ;;  %v1127_v61 = vld [vmem:[%s1940_s2] ss:$0 sm:$0xff] }
  0x4e   : > { %604 = vmatpush.msra.mxu0 %v405_v2  ;;  %595 = vmatpush.msrb.mxu3 %v378_v5  ;;  %v664_v2 = vld [vmem:[%s1941_s3] sm:$0x1f] }
  0x4f   : > { %623 = vmatpush.msra.mxu1 %v422_v3  ;;  %644 = vmatpush.msra.mxu2 %v437_v4 }
  0x50   : > { %605 = vmatpush.msra.mxu0 %v404_v6  ;;  %596 = vmatpush.msrb.mxu3 %v377_v9 }
  0x51   : > { %624 = vmatpush.msra.mxu1 %v421_v7  ;;  %645 = vmatpush.msra.mxu2 %v436_v8 }
  0x52   : > { %606 = vmatpush.msra.mxu0 %v403_v10  ;;  %597 = vmatpush.msrb.mxu3 %v376_v13 }
  0x53   : > { %625 = vmatpush.msra.mxu1 %v420_v11  ;;  %646 = vmatpush.msra.mxu2 %v435_v12 }
  0x54   : > { %579 = vmatmul.f32.vlgmr.msrb.gmra.mxu2 %v1635_v14  ;;  %607 = vmatpush.msra.mxu0 %v402_v15 }
  0x55   : > { %626 = vmatpush.msra.mxu1 %v419_v16  ;;  %647 = vmatpush.msra.mxu2 %v434_v17 }
  0x56   : > { %598 = vmatpush.msrb.mxu3 %v375_v18  ;;  %539 = vmatmul.f32.vlgmr.msrb.gmra.mxu0 %v1650_v19 }
  0x57   : > { %599 = vmatmul.f32.vlgmr.msrb.gmra.mxu3 %v1654_v20  ;;  %608 = vmatpush.msra.mxu0 %v401_v21 }
  0x58   : > { %627 = vmatpush.msra.mxu1 %v418_v22  ;;  %648 = vmatpush.msra.mxu2 %v433_v23 }
  0x59   : > { %559 = vmatmul.f32.vlgmr.msrb.gmra.mxu1 %v1667_v24  ;;  %609 = vmatpush.msra.mxu0 %v400_v25 }
  0x5a   : > { %628 = vmatpush.msra.mxu1 %v417_v26  ;;  %649 = vmatpush.msra.mxu2 %v432_v27 }
  0x5b   : > { %610 = vmatpush.msra.mxu0 %v399_v28  ;;  %1091 = vmatpush.msk.msra.mxu3 %vm673_vm0, %v664_v2  ;;  %v738_v28 = vld [vmem:[%s1943_s5 + $0xb0] sm:$0x3f] }
  0x5c   : > { %629 = vmatpush.msra.mxu1 %v416_v29  ;;  %650 = vmatpush.msra.mxu2 %v431_v30  ;;  %v741_v29 = vld [vmem:[%s1943_s5 + $0xc8] sm:$0x3f]  ;;  %v742_v30 = vld [vmem:[%s1943_s5 + $0xd0] sm:$0x3f] }
  0x5d   : > { %611 = vmatpush.msra.mxu0 %v398_v31  ;;  %1094 = vmatpush.msk.msrb.mxu3 %vm753_vm2, %v738_v28  ;;  %v743_v31 = vld [vmem:[%s1943_s5 + $0xd8] sm:$0x3f] }
  0x5e   : > { %630 = vmatpush.msra.mxu1 %v415_v32  ;;  %651 = vmatpush.msra.mxu2 %v430_v33  ;;  %v727_v32 = vld [vmem:[%s1943_s5 + $0x58] sm:$0xff]  ;;  %v730_v33 = vld [vmem:[%s1943_s5 + $0x70] sm:$0xff] }
  0x5f   : > { %612 = vmatpush.msra.mxu0 %v397_v34  ;;  %v731_v34 = vld [vmem:[%s1943_s5 + $0x78] sm:$0xff]  ;;  %801 = vmatpush.msrb.mxu3 %v727_v32 }
  0x60   : > { %631 = vmatpush.msra.mxu1 %v414_v35  ;;  %652 = vmatpush.msra.mxu2 %v429_v36  ;;  %v1128_v35 = vld [vmem:[%s1942_s4] ss:$0 sm:$0xff] }
  0x61   : > { %613 = vmatpush.msra.mxu0 %v396_v37  ;;  %v732_v36 = vld [vmem:[%s1943_s5 + $0x80] sm:$0xff] }
  0x62   : > { %632 = vmatpush.msra.mxu1 %v413_v38  ;;  %653 = vmatpush.msra.mxu2 %v428_v39  ;;  %v716_v37 = vld [vmem:[%s1943_s5] sm:$0xff]  ;;  %v719_v38 = vld [vmem:[%s1943_s5 + $0x18] sm:$0xff] }
  0x63   : > { %614 = vmatpush.msra.mxu0 %v395_v40  ;;  %v720_v39 = vld [vmem:[%s1943_s5 + $0x20] sm:$0xff]  ;;  %802 = vmatpush.msrb.mxu3 %v716_v37  ;;  %v721_v40 = vld [vmem:[%s1943_s5 + $0x28] sm:$0xff] }
  0x64   : > { %633 = vmatpush.msra.mxu1 %v412_v41  ;;  %654 = vmatpush.msra.mxu2 %v427_v42  ;;  %v739_v41 = vld [vmem:[%s1943_s5 + $0xb8] sm:$0x3f] }
  0x65   : > { %615 = vmatpush.msra.mxu0 %v394_v43  ;;  %v728_v43 = vld [vmem:[%s1943_s5 + $0x60] sm:$0xff] }
  0x66   : > { %634 = vmatpush.msra.mxu1 %v411_v44  ;;  %655 = vmatpush.msra.mxu2 %v426_v45  ;;  %v745_v44 = vld [vmem:[%s1943_s5 + $0xe8] sm:$0x3f]  ;;  %v746_v45 = vld [vmem:[%s1943_s5 + $0xf0] sm:$0x3f] }
  0x67   : > { %616 = vmatpush.msra.mxu0 %v393_v46 }
  0x68   : > { %635 = vmatpush.msra.mxu1 %v410_v47  ;;  %656 = vmatpush.msra.mxu2 %v425_v48  ;;  %v747_v47 = vld [vmem:[%s1943_s5 + $0xf8] sm:$0x3f]  ;;  %v734_v48 = vld [vmem:[%s1943_s5 + $0x90] sm:$0xff] }
  0x69   : > { %617 = vmatpush.msra.mxu0 %v392_v49  ;;  %v735_v49 = vld [vmem:[%s1943_s5 + $0x98] sm:$0xff] }
  0x6a   : > { %636 = vmatpush.msra.mxu1 %v409_v50  ;;  %657 = vmatpush.msra.mxu2 %v424_v51  ;;  %v736_v50 = vld [vmem:[%s1943_s5 + $0xa0] sm:$0xff]  ;;  %v717_v51 = vld [vmem:[%s1943_s5 + $0x8] sm:$0xff] }
  0x6b   : > { %618 = vmatpush.msra.mxu0 %v391_v52  ;;  %v723_v52 = vld [vmem:[%s1943_s5 + $0x38] sm:$0xff] }
  0x6c   : > { %637 = vmatpush.msra.mxu1 %v408_v53  ;;  %658 = vmatpush.msra.mxu2 %v423_v54  ;;  %v724_v54 = vld [vmem:[%s1943_s5 + $0x40] sm:$0xff] }
  0x6d   : > { %619 = vmatmul.f32.vlgmr.msra.gmra.mxu0 %v1762_v56  ;;  %659 = vmatmul.f32.vlgmr.msra.gmra.mxu2 %v1765_v57 }
  0x6e   : > { %638 = vmatpush.msra.mxu1 %v407_v58  ;;  %1100 = vmatpush.msk.msrb.mxu0 %vm753_vm2, %v741_v29  ;;  %v725_v58 = vld [vmem:[%s1943_s5 + $0x48] sm:$0xff] }
  0x6f   : > { %639 = vmatmul.f32.vlgmr.msra.gmra.mxu1 %v1771_v59  ;;  %1104 = vmatpush.msk.msrb.mxu2 %vm753_vm2, %v743_v31 }
  0x70   : > { %1102 = vmatpush.msk.msrb.mxu1 %vm753_vm2, %v742_v30  ;;  %861 = vmatpush.msrb.mxu0 %v730_v33 }
  0x71   : > { %901 = vmatpush.msrb.mxu2 %v732_v36 }
  0x72   : > { %881 = vmatpush.msrb.mxu1 %v731_v34  ;;  %862 = vmatpush.msrb.mxu0 %v719_v38 }
  0x73   : > { %902 = vmatpush.msrb.mxu2 %v721_v40 }
  0x74   : > { %882 = vmatpush.msrb.mxu1 %v720_v39  ;;  %1108 = vmatpush.msk.msra.mxu0 %vm753_vm2, %v745_v44 }
  0x75   : > { %1112 = vmatpush.msk.msra.mxu2 %vm753_vm2, %v747_v47 }
  0x76   : > { %1110 = vmatpush.msk.msra.mxu1 %vm753_vm2, %v746_v45  ;;  %941 = vmatpush.msra.mxu0 %v734_v48 }
  0x77   : > { %981 = vmatpush.msra.mxu2 %v736_v50 }
  0x78   : > { %961 = vmatpush.msra.mxu1 %v735_v49  ;;  %942 = vmatpush.msra.mxu0 %v723_v52 }
  0x79   : > { %982 = vmatpush.msra.mxu2 %v725_v58 }
  0x7a   : > { %962 = vmatpush.msra.mxu1 %v724_v54 }
  0xc2   : > { %v460_v62 = vpop.f32.mrf.mxu0 }
  0xc3   : > { %v461_v63 = vadd.f32 %v1127_v61, %v460_v62 }
  0xc6   : > { %v480_v3 = vpop.f32.mrf.mxu1 }
  0xc7   : > { %v481_v4 = vadd.f32 %v480_v3, %v461_v63 }
  0xce   : > { %v520_v7 = vpop.f32.mrf.mxu3 }
  0xcf   : > { %v500_v5 = vpop.f32.mrf.mxu2 }
  0xd0   : > { %v501_v6 = vadd.f32 %v500_v5, %v481_v4 }
  0xd2   : > { %v521_v8 = vadd.f32 %v520_v7, %v501_v6 }
  0xd3   : > { %v540_v9 = vpop.f32.mrf.mxu0 }
  0xd4   : > { %v541_v10 = vadd.f32 %v540_v9, %v521_v8 }
  0xd6   : > { %v560_v11 = vpop.f32.mrf.mxu1 }
  0xd7   : > { %v561_v12 = vadd.f32 %v560_v11, %v541_v10  ;;  %v580_v13 = vpop.f32.mrf.mxu2  ;;  %v740_v11 = vld [vmem:[%s1943_s5 + $0xc0] sm:$0x3f] }
  0xd9   : > { %v581_v15 = vadd.f32 %v580_v13, %v561_v12  ;;  %v729_v12 = vld [vmem:[%s1943_s5 + $0x68] sm:$0xff]  ;;  %v718_v13 = vld [vmem:[%s1943_s5 + $0x10] sm:$0xff] }
  0xda   : > { %v600_v16 = vpop.f32.mrf.mxu3 }
  0xdb   : > { %v601_v17 = vadd.f32 %v600_v16, %v581_v15  ;;  %v744_v15 = vld [vmem:[%s1943_s5 + $0xe0] sm:$0x3f]  ;;  %v733_v16 = vld [vmem:[%s1943_s5 + $0x88] sm:$0xff] }
  0xea   : > { %v620_v18 = vpop.f32.mrf.mxu0 }
  0xeb   : > { %v621_v21 = vadd.f32 %v620_v18, %v601_v17  ;;  %v722_v17 = vld [vmem:[%s1943_s5 + $0x30] sm:$0xff]  ;;  %v748_v18 = vld [vmem:[%s1943_s5 + $0x100] sm:$0x3f] }
  0xec   : > { %v640_v22 = vpop.f32.mrf.mxu1 }
  0xed   : > { %v641_v23 = vadd.f32 %v640_v22, %v621_v21  ;;  %v737_v21 = vld [vmem:[%s1943_s5 + $0xa8] sm:$0xff]  ;;  %v726_v22 = vld [vmem:[%s1943_s5 + $0x50] sm:$0xff] }
  0xf0   : > { %v660_v25 = vpop.f32.mrf.mxu2 }
  0xf1   : > { %v661_v26 = vadd.f32 %v660_v25, %v641_v23 }
  0xf3   : > { %v663_v27 = vmax.f32 %v661_v26, 0.0 }
  0xf5   : > { %1092 = vmatmul.msk.f32.vlgmr.msra.gmra.mxu3 %vm669_vm1, %v663_v27 }
  0xf6   : > { %1096 = vmatpush.msk.msra.mxu3 %vm753_vm2, %v739_v41 }
  0xf8   : > { %821 = vmatpush.msra.mxu3 %v728_v43 }
  0xfa   : > { %822 = vmatpush.msra.mxu3 %v717_v51 }
 0x178   : > { %v694_v42 = vpop.f32.mrf.mxu3 }
 0x179   : > { %v695_v46 = vadd.f32 %v1128_v35, %v694_v42 }
 0x17b   : > { %v1093_v53 = vmul.f32 -1.442695, %v695_v46 }
 0x17d   : > { %1129 = vpow2.f32 %v1093_v53 }
 0x183   : > { %v1130_v61 = vpop.eup %1129 }
 0x184   : > { %v700_v62 = vadd.f32 1.0, %v1130_v61 }
 0x186   : > { %1131 = vrcp.f32 %v700_v62  ;;  %v712_v4 = vand.u32 2147483648, %v700_v62  ;;  %v710_v6 = vand.u32 2147483647, %v700_v62  ;;  %vm706_vm4 = vweird.f32 %v700_v62 }
 0x188   : > { %v713_v8 = vor.u32 1.1754944e-38, %v712_v4  ;;  %vm711_vm7 = vcmp.eq.f32.partialorder %v710_v6, 8.507059e+37 }
 0x18c   : > { %v1132_v63 = vpop.eup %1131 }
 0x18d   : > { %v702_v2 = vmul.f32 %v1132_v63, %v700_v62  ;;  %vm707_vm3 = vweird.f32 %v1132_v63 }
 0x18e   : > { %vm708_vm5 = vmor %vm706_vm4, %vm707_vm3 }
 0x18f   : > { %v703_v3 = vsub.f32 1.0, %v702_v2 }
 0x191   : > { %v704_v5 = vmul.f32 %v1132_v63, %v703_v3 }
 0x193   : > { %v705_v7 = vadd.f32 %v1132_v63, %v704_v5 }
 0x195   : > { %v709_v9 = vsel %vm708_vm5, %v1132_v63, %v705_v7 }
 0x196   : > { %v714_v10 = vsel %vm711_vm7, %v713_v8, %v709_v9 }
 0x197   : > { %1095 = vmatmul.msk.f32.vlgmr.msrb.gmra.mxu3 %vm749_vm6, %v714_v10  ;;  %1101 = vmatmul.msk.f32.vlgmr.msrb.gmra.mxu0 %vm749_vm6, %v714_v10 }
 0x198   : > { %1103 = vmatmul.msk.f32.vlgmr.msrb.gmra.mxu1 %vm749_vm6, %v714_v10  ;;  %1105 = vmatmul.msk.f32.vlgmr.msrb.gmra.mxu2 %vm749_vm6, %v714_v10 }
 0x199   : > { %1098 = vmatpush.msk.msrb.mxu3 %vm753_vm2, %v740_v11 }
 0x19b   : > { %841 = vmatpush.msrb.mxu3 %v729_v12 }
 0x19d   : > { %842 = vmatpush.msrb.mxu3 %v718_v13 }
 0x19f   : > { %1097 = vmatmul.msk.f32.vlgmr.msra.gmra.mxu3 %vm749_vm6, %v714_v10  ;;  %1109 = vmatmul.msk.f32.vlgmr.msra.gmra.mxu0 %vm749_vm6, %v714_v10 }
 0x1a0   : > { %1111 = vmatmul.msk.f32.vlgmr.msra.gmra.mxu1 %vm749_vm6, %v714_v10  ;;  %1113 = vmatmul.msk.f32.vlgmr.msra.gmra.mxu2 %vm749_vm6, %v714_v10 }
 0x1a1   : > { %1106 = vmatpush.msk.msra.mxu3 %vm753_vm2, %v744_v15 }
 0x1a3   : > { %921 = vmatpush.msra.mxu3 %v733_v16 }
 0x1a5   : > { %922 = vmatpush.msra.mxu3 %v722_v17 }
 0x1a7   : > { %1099 = vmatmul.msk.f32.vlgmr.msrb.gmra.mxu3 %vm749_vm6, %v714_v10 }
 0x1a8   : > { %1114 = vmatpush.msk.msrb.mxu3 %vm753_vm2, %v748_v18 }
 0x1aa   : > { %1001 = vmatpush.msrb.mxu3 %v737_v21 }
 0x1ac   : > { %1002 = vmatpush.msrb.mxu3 %v726_v22 }
 0x1af   : > { %1107 = vmatmul.msk.f32.vlgmr.msra.gmra.mxu3 %vm749_vm6, %v714_v10 }
 0x1b7   : > { %1115 = vmatmul.msk.f32.vlgmr.msrb.gmra.mxu3 %vm749_vm6, %v714_v10 }
 0x214   : > { %v864_v23 = vpop.f32.mrf.mxu0 }
 0x215   : > { %v1010_v25 = vmul.f32 %v864_v23, %v1593_v1  ;;  %v884_v26 = vpop.f32.mrf.mxu1 }
 0x216   : > { %v1011_v27 = vmul.f32 %v884_v26, %v1650_v19 }
 0x217   : > { %1021 = vst [vmem:[%s1911_s27 + $0x18] sm:$0xff] %v1010_v25 }
 0x218   : > { %1022 = vst [vmem:[%s1911_s27 + $0x20] sm:$0xff] %v1011_v27 }
 0x21a   : > { %v804_v28 = vpop.f32.mrf.mxu3 }
 0x21b   : > { %v1007_v29 = vmul.f32 %v804_v28, %v1562_v55  ;;  %v904_v30 = vpop.f32.mrf.mxu2 }
 0x21c   : > { %v1012_v31 = vmul.f32 %v904_v30, %v1667_v24  ;;  %v944_v32 = vpop.f32.mrf.mxu0 }
 0x21d   : > { %1018 = vst [vmem:[%s1911_s27] sm:$0xff] %v1007_v29  ;;  %v1014_v33 = vmul.f32 %v944_v32, %v1654_v20  ;;  %v964_v1 = vpop.f32.mrf.mxu1 }
 0x21e   : > { %1023 = vst [vmem:[%s1911_s27 + $0x28] sm:$0xff] %v1012_v31  ;;  %v1015_v19 = vmul.f32 %v964_v1, %v1762_v56 }
 0x21f   : > { %1025 = vst [vmem:[%s1911_s27 + $0x38] sm:$0xff] %v1014_v33 }
 0x220   : > { %1026 = vst [vmem:[%s1911_s27 + $0x40] sm:$0xff] %v1015_v19 }
 0x222   : > { %v824_v34 = vpop.f32.mrf.mxu3 }
 0x223   : > { %v1008_v55 = vmul.f32 %v824_v34, %v1590_v0  ;;  %v984_v35 = vpop.f32.mrf.mxu2 }
 0x224   : > { %v1016_v36 = vmul.f32 %v984_v35, %v1771_v59 }
 0x225   : > { %1019 = vst [vmem:[%s1911_s27 + $0x8] sm:$0xff] %v1008_v55 }
 0x226   : > { %1027 = vst [vmem:[%s1911_s27 + $0x48] sm:$0xff] %v1016_v36 }
 0x22a   : > { %v844_v24 = vpop.f32.mrf.mxu3 }
 0x22b   : > { %v1009_v37 = vmul.f32 %v844_v24, %v1578_v60 }
 0x22d   : > { %1020 = vst [vmem:[%s1911_s27 + $0x10] sm:$0xff] %v1009_v37 }
 0x232   : > { %v924_v20 = vpop.f32.mrf.mxu3 }
 0x233   : > { %v1013_v38 = vmul.f32 %v924_v20, %v1635_v14 }
 0x235   : > { %1024 = vst [vmem:[%s1911_s27 + $0x30] sm:$0xff] %v1013_v38 }
 0x23a   : > { %v1004_v56 = vpop.f32.mrf.mxu3 }
 0x23b   : > { %v1017_v39 = vmul.f32 %v1004_v56, %v1765_v57 }
 0x23d   : > { %1028 = vst [vmem:[%s1911_s27 + $0x50] sm:$0xff] %v1017_v39 }
 0x23e PF: > { %s16_s21 = sadd.s32 1, %s1139_s21  }
 0x23f   : > { %p13_p4 = scmp.ge.s32.totalorder %s16_s21, 4  }
 0x241   :  { %15 = sbr.rel (!%p13_p4) target bundleno = 1 (0x1), region = 74 }

</bundles_post_ra>
